<compile_context>
chip_gen: v5e
topology: v5e:2x2
jax: 0.10.0
libtpu: 0.0.40
codegen_flags: <defaults>
</compile_context>

<pallas_src>
import jax
import jax.numpy as jnp
from jax.experimental import pallas as pl
from jax.experimental.pallas import tpu as pltpu


def _round_up(x, m):
    return (x + m - 1) // m * m


def vera_kernel(x_ref, wt_ref, at_ref, bt_ref, bias_ref, o_ref, acc_y, acc_xa):
    # grid = (M tiles, N tiles, K tiles); K (in_features) is innermost / "arbitrary".
    k = pl.program_id(2)

    @pl.when(k == 0)
    def _():
        acc_y[...] = jnp.zeros_like(acc_y)
        acc_xa[...] = jnp.zeros_like(acc_xa)

    x = x_ref[...]                                                   # (tm, tk)
    # Main dense path: x @ W^T  (contraction on last axis, MXU)
    acc_y[...] += jnp.dot(x, wt_ref[...], preferred_element_type=jnp.float32)
    # Low-rank path, stage 1: x @ (lam_d*A)^T  -> (tm, r)
    acc_xa[...] += jnp.dot(x, at_ref[...], preferred_element_type=jnp.float32)

    @pl.when(k == pl.num_programs(2) - 1)
    def _():
        # Low-rank path, stage 2: (x A_s^T) @ (lam_b*B)^T  -> (tm, tn)
        lowrank = jnp.dot(acc_xa[...], bt_ref[...],
                          preferred_element_type=jnp.float32)
        o_ref[...] = (acc_y[...] + lowrank + bias_ref[...]).astype(o_ref.dtype)


def vera_forward(x, W, bias, A, B, lam_d, lam_b):
    """VeRA-adapted linear layer. x: (..., in_features) -> (..., out_features)."""
    in_f = x.shape[-1]
    out_f = W.shape[0]
    r = A.shape[0]
    lead = x.shape[:-1]

    # ---- One-time parameter prep outside the hot loop -----------------------
    # Fold the trainable scaling vectors into the frozen projections and
    # pre-transpose everything so the kernel never transposes a tile.
    At = (lam_d * A).T            # (in_f, r)    == (lam_d*A)^T
    Bt = (lam_b * B).T            # (r, out_f)   == (lam_b*B)^T
    Wt = W.T                      # (in_f, out_f)
    bias2d = bias.reshape(1, out_f)

    # Pad rank to a sublane multiple (zeros contribute nothing).
    r_pad = _round_up(r, 8)
    if r_pad != r:
        At = jnp.pad(At, ((0, 0), (0, r_pad - r)))
        Bt = jnp.pad(Bt, ((0, r_pad - r), (0, 0)))

    # ---- Row (M) tiling with padding so any batch*seq works -----------------
    x2d = x.reshape(-1, in_f)
    M = x2d.shape[0]
    if M >= 256:
        tm = 256
    elif M >= 128:
        tm = 128
    else:
        tm = _round_up(M, 8)
    M_pad = _round_up(M, tm)
    if M_pad != M:
        x2d = jnp.pad(x2d, ((0, M_pad - M), (0, 0)))

    # ---- N / K tiling: large lane-dense tiles when divisible, else full dim --
    def _pick(dim, candidates):
        for c in candidates:
            if dim >= c and dim % c == 0:
                return c
        return dim

    tn = _pick(out_f, (512, 256, 128))   # output tile: multiple of 128 when possible
    tk = _pick(in_f, (512, 256, 128))    # reduction tile

    grid = (M_pad // tm, out_f // tn, in_f // tk)

    out2d = pl.pallas_call(
        vera_kernel,
        out_shape=jax.ShapeDtypeStruct((M_pad, out_f), x.dtype),
        grid=grid,
        in_specs=[
            pl.BlockSpec((tm, tk), lambda i, j, k: (i, k)),      # x tile
            pl.BlockSpec((tk, tn), lambda i, j, k: (k, j)),      # W^T tile
            pl.BlockSpec((tk, r_pad), lambda i, j, k: (k, 0)),   # (lam_d*A)^T tile
            pl.BlockSpec((r_pad, tn), lambda i, j, k: (0, j)),   # (lam_b*B)^T tile
            pl.BlockSpec((1, tn), lambda i, j, k: (0, j)),       # bias (lane-dense)
        ],
        out_specs=pl.BlockSpec((tm, tn), lambda i, j, k: (i, j)),
        scratch_shapes=[
            pltpu.VMEM((tm, tn), jnp.float32),     # y accumulator
            pltpu.VMEM((tm, r_pad), jnp.float32),  # (x @ A_s^T) accumulator
        ],
        compiler_params=pltpu.CompilerParams(
            dimension_semantics=("parallel", "parallel", "arbitrary")),
    )(x2d, Wt, At, Bt, bias2d)

    if M_pad != M:
        out2d = out2d[:M]
    return out2d.reshape(*lead, out_f)


if __name__ == "__main__":
    # Small shapes consistent with the module's forward.
    batch, seq = 2, 8
    in_features, out_features, r = 32, 32, 8
    d_initial = 0.1

    key = jax.random.PRNGKey(0)
    k_x, k_w, k_b, k_A, k_B = jax.random.split(key, 5)

    x = jax.random.normal(k_x, (batch, seq, in_features), dtype=jnp.float32)

    # Existing linear layer parameters (deterministic synthetic init).
    W = jax.random.normal(k_w, (out_features, in_features), dtype=jnp.float32) * 0.05
    bias = jax.random.normal(k_b, (out_features,), dtype=jnp.float32) * 0.05

    # VeRA frozen random projections, xavier_normal_ as in reset_parameters().
    std_A = (2.0 / (r + in_features)) ** 0.5
    std_B = (2.0 / (out_features + r)) ** 0.5
    A = jax.random.normal(k_A, (r, in_features), dtype=jnp.float32) * std_A
    B = jax.random.normal(k_B, (out_features, r), dtype=jnp.float32) * std_B

    # Trainable scaling vectors. reset_parameters() would set lambda_d=d_initial
    # and lambda_b=0; use a small nonzero lambda_b so the adapter path is
    # actually exercised numerically.
    lam_d = jnp.full((r, 1), d_initial, dtype=jnp.float32)
    lam_b = jnp.full((out_features, 1), 0.02, dtype=jnp.float32)

    out = vera_forward(x, W, bias, A, B, lam_d, lam_b)
    out = jax.block_until_ready(out)

    # Reference (plain JAX) check of the exact VeRA math (weight-side form).
    w_eq_ref = W + (lam_b * B) @ (lam_d * A)
    ref = x @ w_eq_ref.T + bias
    assert out.shape == (batch, seq, out_features)
    assert jnp.allclose(out, ref, atol=1e-5, rtol=1e-5)

    print("KERNEL_OK")
</pallas_src>

<mosaic_0001>
module attributes {stable_mosaic.version = 11 : i64} {
  func.func @vera_kernel(%arg0: i32, %arg1: i32, %arg2: i32, %arg3: memref<16x32xf32, #tpu.memory_space<vmem>>, %arg4: memref<32x32xf32, #tpu.memory_space<vmem>>, %arg5: memref<32x8xf32, #tpu.memory_space<vmem>>, %arg6: memref<8x32xf32, #tpu.memory_space<vmem>>, %arg7: memref<1x32xf32, #tpu.memory_space<vmem>>, %arg8: memref<16x32xf32, #tpu.memory_space<vmem>>, %arg9: memref<16x32xf32, #tpu.memory_space<vmem>>, %arg10: memref<16x8xf32, #tpu.memory_space<vmem>>) attributes {dimension_semantics = [#tpu.dimension_semantics<parallel>, #tpu.dimension_semantics<parallel>, #tpu.dimension_semantics<arbitrary>], iteration_bounds = array<i64: 1, 1, 1>, scalar_prefetch = 0 : i64, scratch_operands = 2 : i64, tpu.core_type = #tpu.core_type<tc>, window_params = [{transform_indices = @transform_0, window_bounds = array<i64: 16, 32>}, {transform_indices = @transform_1, window_bounds = array<i64: 32, 32>}, {transform_indices = @transform_2, window_bounds = array<i64: 32, 8>}, {transform_indices = @transform_3, window_bounds = array<i64: 8, 32>}, {transform_indices = @transform_4, window_bounds = array<i64: 1, 32>}, {transform_indices = @transform_5, window_bounds = array<i64: 16, 32>}]} {
    %c0_i32 = arith.constant 0 : i32
    %0 = arith.cmpi eq, %arg2, %c0_i32 : i32
    %1 = arith.extui %0 : i1 to i32
    %c0_i32_0 = arith.constant 0 : i32
    %2 = arith.cmpi ne, %1, %c0_i32_0 : i32
    scf.if %2 {
      %cst_17 = arith.constant 0.000000e+00 : f32
      %17 = vector.broadcast %cst_17 : f32 to vector<16x32xf32>
      %c0_18 = arith.constant 0 : index
      %c0_19 = arith.constant 0 : index
      %18 = vector.load %arg9[%c0_18, %c0_19] : memref<16x32xf32, #tpu.memory_space<vmem>>, vector<16x32xf32>
      tpu.vector_store %arg9[%c0_18, %c0_19], %17 {strides = array<i32>} : memref<16x32xf32, #tpu.memory_space<vmem>>, vector<16x32xf32>,
      %cst_20 = arith.constant 0.000000e+00 : f32
      %19 = vector.broadcast %cst_20 : f32 to vector<16x8xf32>
      %c0_21 = arith.constant 0 : index
      %c0_22 = arith.constant 0 : index
      %20 = vector.load %arg10[%c0_21, %c0_22] : memref<16x8xf32, #tpu.memory_space<vmem>>, vector<16x8xf32>
      tpu.vector_store %arg10[%c0_21, %c0_22], %19 {strides = array<i32>} : memref<16x8xf32, #tpu.memory_space<vmem>>, vector<16x8xf32>,
    } else {
    }
    %c0 = arith.constant 0 : index
    %c0_1 = arith.constant 0 : index
    %3 = vector.load %arg3[%c0, %c0_1] : memref<16x32xf32, #tpu.memory_space<vmem>>, vector<16x32xf32>
    %c0_2 = arith.constant 0 : index
    %c0_3 = arith.constant 0 : index
    %4 = vector.load %arg9[%c0_2, %c0_3] : memref<16x32xf32, #tpu.memory_space<vmem>>, vector<16x32xf32>
    %c0_4 = arith.constant 0 : index
    %c0_5 = arith.constant 0 : index
    %5 = vector.load %arg4[%c0_4, %c0_5] : memref<32x32xf32, #tpu.memory_space<vmem>>, vector<32x32xf32>
    %cst = arith.constant dense<0.000000e+00> : vector<16x32xf32>
    %6 = tpu.matmul %3, %5, %cst {dimension_numbers = #tpu.dot_dimension_numbers<[1], [0], [0], [1], [0, 0, 1, 1], [], []>} : vector<16x32xf32>, vector<32x32xf32>, vector<16x32xf32> -> vector<16x32xf32>
    %7 = arith.addf %4, %6 : vector<16x32xf32>
    %c0_6 = arith.constant 0 : index
    %c0_7 = arith.constant 0 : index
    %8 = vector.load %arg9[%c0_6, %c0_7] : memref<16x32xf32, #tpu.memory_space<vmem>>, vector<16x32xf32>
    tpu.vector_store %arg9[%c0_6, %c0_7], %7 {strides = array<i32>} : memref<16x32xf32, #tpu.memory_space<vmem>>, vector<16x32xf32>,
    %c0_8 = arith.constant 0 : index
    %c0_9 = arith.constant 0 : index
    %9 = vector.load %arg10[%c0_8, %c0_9] : memref<16x8xf32, #tpu.memory_space<vmem>>, vector<16x8xf32>
    %c0_10 = arith.constant 0 : index
    %c0_11 = arith.constant 0 : index
    %10 = vector.load %arg5[%c0_10, %c0_11] : memref<32x8xf32, #tpu.memory_space<vmem>>, vector<32x8xf32>
    %cst_12 = arith.constant dense<0.000000e+00> : vector<16x8xf32>
    %11 = tpu.matmul %3, %10, %cst_12 {dimension_numbers = #tpu.dot_dimension_numbers<[1], [0], [0], [1], [0, 0, 1, 1], [], []>} : vector<16x32xf32>, vector<32x8xf32>, vector<16x8xf32> -> vector<16x8xf32>
    %12 = arith.addf %9, %11 : vector<16x8xf32>
    %c0_13 = arith.constant 0 : index
    %c0_14 = arith.constant 0 : index
    %13 = vector.load %arg10[%c0_13, %c0_14] : memref<16x8xf32, #tpu.memory_space<vmem>>, vector<16x8xf32>
    tpu.vector_store %arg10[%c0_13, %c0_14], %12 {strides = array<i32>} : memref<16x8xf32, #tpu.memory_space<vmem>>, vector<16x8xf32>,
    %c0_i32_15 = arith.constant 0 : i32
    %14 = arith.cmpi eq, %arg2, %c0_i32_15 : i32
    %15 = arith.extui %14 : i1 to i32
    %c0_i32_16 = arith.constant 0 : i32
    %16 = arith.cmpi ne, %15, %c0_i32_16 : i32
    scf.if %16 {
      %c0_17 = arith.constant 0 : index
      %c0_18 = arith.constant 0 : index
      %17 = vector.load %arg10[%c0_17, %c0_18] : memref<16x8xf32, #tpu.memory_space<vmem>>, vector<16x8xf32>
      %c0_19 = arith.constant 0 : index
      %c0_20 = arith.constant 0 : index
      %18 = vector.load %arg6[%c0_19, %c0_20] : memref<8x32xf32, #tpu.memory_space<vmem>>, vector<8x32xf32>
      %cst_21 = arith.constant dense<0.000000e+00> : vector<16x32xf32>
      %19 = tpu.matmul %17, %18, %cst_21 {dimension_numbers = #tpu.dot_dimension_numbers<[1], [0], [0], [1], [0, 0, 1, 1], [], []>} : vector<16x8xf32>, vector<8x32xf32>, vector<16x32xf32> -> vector<16x32xf32>
      %c0_22 = arith.constant 0 : index
      %c0_23 = arith.constant 0 : index
      %20 = vector.load %arg9[%c0_22, %c0_23] : memref<16x32xf32, #tpu.memory_space<vmem>>, vector<16x32xf32>
      %21 = arith.addf %20, %19 : vector<16x32xf32>
      %c0_24 = arith.constant 0 : index
      %c0_25 = arith.constant 0 : index
      %22 = vector.load %arg7[%c0_24, %c0_25] : memref<1x32xf32, #tpu.memory_space<vmem>>, vector<1x32xf32>
      %23 = vector.broadcast %22 : vector<1x32xf32> to vector<16x32xf32>
      %24 = arith.addf %21, %23 : vector<16x32xf32>
      %c0_26 = arith.constant 0 : index
      %c0_27 = arith.constant 0 : index
      %25 = vector.load %arg8[%c0_26, %c0_27] : memref<16x32xf32, #tpu.memory_space<vmem>>, vector<16x32xf32>
      tpu.vector_store %arg8[%c0_26, %c0_27], %24 {strides = array<i32>} : memref<16x32xf32, #tpu.memory_space<vmem>>, vector<16x32xf32>,
    } else {
    }
    return
  }
  func.func @transform_0(%arg0: i32, %arg1: i32, %arg2: i32) -> (i32, i32) {
    %c0_i32 = arith.constant 0 : i32
    return %arg0, %arg2 : i32, i32
  }
  func.func @transform_1(%arg0: i32, %arg1: i32, %arg2: i32) -> (i32, i32) {
    %c0_i32 = arith.constant 0 : i32
    return %arg2, %arg1 : i32, i32
  }
  func.func @transform_2(%arg0: i32, %arg1: i32, %arg2: i32) -> (i32, i32) {
    %c0_i32 = arith.constant 0 : i32
    %c0_i32_0 = arith.constant 0 : i32
    return %arg2, %c0_i32 : i32, i32
  }
  func.func @transform_3(%arg0: i32, %arg1: i32, %arg2: i32) -> (i32, i32) {
    %c0_i32 = arith.constant 0 : i32
    %c0_i32_0 = arith.constant 0 : i32
    return %c0_i32, %arg1 : i32, i32
  }
  func.func @transform_4(%arg0: i32, %arg1: i32, %arg2: i32) -> (i32, i32) {
    %c0_i32 = arith.constant 0 : i32
    %c0_i32_0 = arith.constant 0 : i32
    return %c0_i32, %arg1 : i32, i32
  }
  func.func @transform_5(%arg0: i32, %arg1: i32, %arg2: i32) -> (i32, i32) {
    %c0_i32 = arith.constant 0 : i32
    return %arg0, %arg1 : i32, i32
  }
}

</mosaic_0001>

<bundles_post_ra>
// kernel: tpu_custom_call.1
= control target key start
LH: loop header
LB: loop body
LE: loop exit
PB: predicated region body
PF: predicated region fallthrough
CT: control target
= control target key end

     0   :  { %10 = vsyncpa [#allocation5], 0  ;;  %s350_s0 = inlined_call_operand.hbm [shape: f32[16,32], index: 0, kind: input, shape index: {}]   ;;  %s351_s1 = inlined_call_operand.vmem [shape: f32[32,32], index: 1, kind: input, shape index: {}]   ;;  %s352_s2 = inlined_call_operand.vmem [shape: f32[32,8], index: 2, kind: input, shape index: {}]   ;;  %s353_s3 = inlined_call_operand.vmem [shape: f32[8,32], index: 3, kind: input, shape index: {}]   ;;  %s354_s4 = inlined_call_operand.vmem [shape: f32[1,32], index: 4, kind: input, shape index: {}]   ;;  %s355_s5 = inlined_call_operand.hbm [shape: f32[16,32], index: 5, kind: output, shape index: {}]  }
   0x1   :  { %11 = vsyncpa [#allocation6], 0  ;;  %s16_s20 = sshll.u32 %s350_s0, 4  ;;  %s257_s21 = smov [#allocation4]   ;;  %s17_s20 = int_to_ptr.hbm [resolvable:$true] %s16_s20 }
   0x2   :  { %s18_s22 = sshll.u32 %s257_s21, 4  ;;  %s258_s23 = smov 128   ;;  %s19_s22 = int_to_ptr.vmem [resolvable:$true] %s18_s22 }
   0x3   :  { %s259_s24 = smov 8  }
   0x4   :  { %24 = dma.hbm_to_vmem [thread:$0]  %s17_s20, 256, %s19_s22, [#allocation5], %s258_s23, %s258_s23, %s259_s24  }
   0x5   :  { %253 = dma.done.wait [#allocation5], 256  }
   0x6   :  { %254 = vsyncadd [#allocation5], 4294967040  ;;  %vm44_vm0 = vcmask 64512   ;;  %vm41_vm1 = vcmask 261120   ;;  %v260_v0 = vmov 0.0   ;;  %v94_v1 = vld [vmem:[%s352_s2 + $0x18] sm:$0xff] }
   0x7   :  { %45 = vst.msk [vmem:[#allocation3] sm:$0xff] %vm44_vm0, %v260_v0  ;;  %v93_v2 = vld [vmem:[%s352_s2 + $0x10] sm:$0xff]  ;;  %107 = vmatpush.msra.mxu1 %v94_v1  ;;  %v92_v3 = vld [vmem:[%s352_s2 + $0x8] sm:$0xff]  ;;  %v54_v4 = vld [vmem:[%s351_s1 + $0x18] sm:$0xff]  ;;  %s261_s16 = smov [#allocation7]   ;;  %s176_s20 = sshll.u32 %s355_s5, 4  ;;  %s177_s20 = int_to_ptr.hbm [resolvable:$true] %s176_s20 }
   0x8   :  { %42 = vst.msk [vmem:[#allocation2] sm:$0xff] %vm41_vm1, %v260_v0  ;;  %74 = vmatpush.msra.mxu0 %v54_v4  ;;  %v91_v5 = vld [vmem:[%s352_s2] sm:$0xff]  ;;  %195 = vmatpush.msra.mxu3 %v54_v4  ;;  %v48_v7 = vld [vmem:[#allocation4 + $0x8] sm:$0xff]  ;;  %v53_v8 = vld [vmem:[%s351_s1 + $0x10] sm:$0xff]  ;;  %s174_s17 = sshll.u32 %s261_s16, 4  ;;  %s175_s17 = int_to_ptr.vmem [resolvable:$true] %s174_s17 }
   0x9   :  { %43 = vst.msk [vmem:[#allocation2 + $0x8] sm:$0xff] %vm41_vm1, %v260_v0  ;;  %108 = vmatpush.msra.mxu1 %v93_v2  ;;  %v47_v6 = vld [vmem:[#allocation4] sm:$0xff]  ;;  %v52_v9 = vld [vmem:[%s351_s1 + $0x8] sm:$0xff] }
   0xa   :  { %46 = vst.msk [vmem:[#allocation3 + $0x8] sm:$0xff] %vm44_vm0, %v260_v0  ;;  %75 = vmatpush.msra.mxu0 %v53_v8  ;;  %196 = vmatpush.msra.mxu3 %v53_v8  ;;  %v51_v10 = vld [vmem:[%s351_s1] sm:$0xff] }
   0xb   :  { %109 = vmatpush.msra.mxu1 %v92_v3  ;;  %v128_v11 = vld [vmem:[%s353_s3] sm:$0xff] }
   0xc   :  { %76 = vmatpush.msra.mxu0 %v52_v9  ;;  %197 = vmatpush.msra.mxu3 %v52_v9  ;;  %v204_v27 = vld [vmem:[%s354_s4] ss:$0 sm:$0xff] }
   0xd   :  { %110 = vmatpush.msra.mxu1 %v91_v5  ;;  %150 = vmatpush.msra.mxu2 %v128_v11 }
   0xe   :  { %191 = vmatmul.msk.f32.vlgmr.msra.gmra.mxu1 %vm41_vm1, %v47_v6  ;;  %77 = vmatpush.msra.mxu0 %v51_v10  ;;  %v89_v12 = vld [vmem:[#allocation3] sm:$0xff] }
   0xf   :  { %198 = vmatpush.msra.mxu3 %v51_v10  ;;  %189 = vmatmul.msk.f32.vlgmr.msra.gmra.mxu0 %vm41_vm1, %v47_v6  ;;  %v49_v20 = vld [vmem:[#allocation2] sm:$0xff] }
  0x10   :  { %190 = vmatmul.msk.f32.vlgmr.msra.gmra.mxu3 %vm41_vm1, %v48_v7  ;;  %v50_v23 = vld [vmem:[#allocation2 + $0x8] sm:$0xff] }
  0x11   :  { %v90_v15 = vld [vmem:[#allocation3 + $0x8] sm:$0xff] }
  0x16   :  { %192 = vmatmul.msk.f32.gmra.mxu1 %vm41_vm1, %v48_v7 }
  0x8b   :  { %v112_v13 = vpop.f32.mrf.mxu1 }
  0x8c   :  { %v118_v14 = vadd.f32 %v112_v13, %v89_v12  ;;  %v79_v21 = vpop.f32.mrf.mxu0 }
  0x8d   :  { %v85_v22 = vadd.f32 %v79_v21, %v49_v20 }
  0x8e   :  { %121 = vst.msk [vmem:[#allocation3] sm:$0xff] %vm44_vm0, %v118_v14 }
  0x8f   :  { %87 = vst.msk [vmem:[#allocation2] sm:$0xff] %vm41_vm1, %v85_v22 }
  0x93   :  { %v115_v16 = vpop.f32.mrf.mxu1  ;;  %v82_v24 = vpop.f32.mrf.mxu3 }
  0x94   :  { %v119_v17 = vadd.f32 %v115_v16, %v90_v15  ;;  %v86_v25 = vadd.f32 %v82_v24, %v50_v23 }
  0x95   :  { %v126_v18 = vld [vmem:[#allocation3] sm:$0xff] }
  0x96   :  { %122 = vst.msk [vmem:[#allocation3 + $0x8] sm:$0xff] %vm44_vm0, %v119_v17  ;;  %193 = vmatmul.msk.f32.vlgmr.msra.gmra.mxu2 %vm44_vm0, %v126_v18  ;;  %v158_v26 = vld [vmem:[#allocation2] sm:$0xff] }
  0x97   :  { %88 = vst.msk [vmem:[#allocation2 + $0x8] sm:$0xff] %vm41_vm1, %v86_v25 }
  0x9d   :  { %v127_v19 = vld [vmem:[#allocation3 + $0x8] sm:$0xff] }
  0x9e   :  { %194 = vmatmul.msk.f32.gmra.mxu2 %vm44_vm0, %v127_v19  ;;  %v159_v31 = vld [vmem:[#allocation2 + $0x8] sm:$0xff] }
 0x119   :  { %v152_v28 = vpop.f32.mrf.mxu2 }
 0x11a   :  { %v160_v29 = vadd.f32 %v158_v26, %v152_v28 }
 0x11c   :  { %v166_v30 = vadd.f32 %v204_v27, %v160_v29 }
 0x11e   :  { %168 = vst.msk [vmem:[#allocation7] sm:$0xff] %vm41_vm1, %v166_v30 }
 0x121   :  { %v155_v32 = vpop.f32.mrf.mxu2 }
 0x122   :  { %v161_v33 = vadd.f32 %v159_v31, %v155_v32 }
 0x124   :  { %v167_v34 = vadd.f32 %v204_v27, %v161_v33 }
 0x126   :  { %169 = vst.msk [vmem:[#allocation7 + $0x8] sm:$0xff] %vm41_vm1, %v167_v34 }
 0x127   :  { %182 = dma.vmem_to_hbm [thread:$0]  %s175_s17, 256, %s177_s20, [#allocation6], %s258_s23, %s258_s23, %s259_s24  }
 0x128   :  { %255 = dma.done.wait [#allocation6], 256  }
 0x129   :  { %256 = vsyncadd [#allocation6], 4294967040 }
 0x12a   :  { %187 = vsyncpa [#allocation5], 1 }
 0x12b   :  { %188 = vsyncpa [#allocation6], 1 }

</bundles_post_ra>
